<compile_context>
chip_gen: v7x
topology: tpu7x:2x2x1
jax: 0.10.0
libtpu: 0.0.40
codegen_flags: <defaults>
</compile_context>

<pallas_src>
import functools
import math

import jax
import jax.numpy as jnp
from jax import lax
from jax.experimental import pallas as pl
from jax.experimental.pallas import tpu as pltpu


_ONEHOT_MAX_V = 2048          # above this, one-hot matmul FLOPs stop being worth it
_BLOCK_BYTES_CAP = 2 << 20    # per-(T, E) output block


def _round_up(x, m):
    return (x + m - 1) // m * m


def _vmem_budgets():
    """Generation-aware VMEM budgets (resident-table budget, scoped-limit cap)."""
    try:
        cap = int(pltpu.get_tpu_info().vmem_capacity_bytes)
    except Exception:
        cap = 64 << 20                       # conservative default (v7x per-core VMEM)
    # With a single-buffered resident table we keep ~32 MiB free for output
    # pipeline buffers / one-hot intermediate / compiler scratch:
    #   v7x (64 MiB)   -> 32 MiB resident budget, 48 MiB scoped-VMEM cap
    #   v5e/v6e (128)  -> 96 MiB resident budget, 112 MiB scoped-VMEM cap
    resident_budget = max(16 << 20, cap - (32 << 20))
    limit_cap = max(24 << 20, cap - (16 << 20))
    return resident_budget, limit_cap


def _choose_tokens_per_step(n_tokens, bytes_per_row, sublane):
    t = 512
    while t > sublane and t * bytes_per_row > _BLOCK_BYTES_CAP:
        t //= 2
    return max(sublane, min(t, _round_up(n_tokens, sublane)))


# ---------------------------------------------------------------------------
# Path A1: resident table, small V  ->  one-hot MXU gather.
# ---------------------------------------------------------------------------
def _onehot_gather_kernel(tok_ref, emb_ref, out_ref, *, scale, vocab_size):
    ids = tok_ref[...]                                            # (T, 1) int32
    onehot = ids == lax.broadcasted_iota(jnp.int32, (ids.shape[0], vocab_size), 1)
    table = emb_ref[...]                                          # (V, E), VMEM-resident
    if table.dtype == jnp.float32:
        # HIGHEST keeps the f32 selection exact on the MXU (onehot is 0/1).
        gathered = lax.dot_general(
            onehot.astype(jnp.float32), table, (((1,), (0,)), ((), ())),
            precision=lax.Precision.HIGHEST,
            preferred_element_type=jnp.float32)
    else:
        gathered = lax.dot_general(
            onehot.astype(table.dtype), table, (((1,), (0,)), ((), ())),
            preferred_element_type=jnp.float32)
    out_ref[...] = (gathered * scale).astype(out_ref.dtype)


# ---------------------------------------------------------------------------
# Path A2: resident table, large V  ->  grouped dynamic-row gather.
# One dense (group, E) store + full-vreg cast/scale per group instead of
# per-token masked stores.
# ---------------------------------------------------------------------------
def _resident_rowloop_kernel(tok_ref, emb_ref, out_ref, *, scale, tokens_per_step,
                             group):
    def body(g, carry):
        base = pl.multiple_of(g * group, group)
        rows = jnp.concatenate(
            [emb_ref[pl.ds(tok_ref[base + j], 1), :] for j in range(group)], axis=0)
        out_ref[pl.ds(base, group), :] = (
            rows.astype(jnp.float32) * scale).astype(out_ref.dtype)
        return carry

    lax.fori_loop(0, tokens_per_step // group, body, 0)
    # TODO(synk): for sub-32-bit tables, bitcast rows to uint32 before the
    # dynamic row slice to avoid packed-sublane shuffles.


# ---------------------------------------------------------------------------
# Path B: table stays in HBM  ->  per-row DMA gather, double-buffered across
# grid steps, one aggregate semaphore wait per tile.
# ---------------------------------------------------------------------------
def _hbm_gather_kernel(tok_ref, emb_hbm_ref, out_ref, row_buf, sem, *,
                       scale, tokens_per_step):
    i = pl.program_id(0)

    def issue_tile(step, slot):
        base = step * tokens_per_step

        def issue_one(r, carry):
            tok = tok_ref[base + r]                               # SMEM scalar read
            pltpu.make_async_copy(
                emb_hbm_ref.at[pl.ds(tok, 1), :],
                row_buf.at[slot, pl.ds(r, 1), :],
                sem.at[slot],
            ).start()
            return carry

        # Partial unroll trims per-descriptor loop overhead (issue loop is
        # scalar/misc-slot bound: one DMA descriptor per cycle).
        lax.fori_loop(0, tokens_per_step, issue_one, 0, unroll=4)

    # First step: bring in this tile's rows.
    @pl.when(i == 0)
    def _():
        issue_tile(0, 0)

    # Lookahead: issue tile i+1's row DMAs into the other slot *before*
    # draining tile i, so next-tile HBM latency hides behind this tile's
    # compute + writeback (next tile's ids are already scalar-prefetched).
    @pl.when(i + 1 < pl.num_programs(0))
    def _():
        issue_tile(i + 1, (i + 1) % 2)

    slot = i % 2
    # Single aggregate wait: every row copy signals sem[slot] with the same
    # row byte count, so one descriptor covering the whole (T, E) staging slot
    # drains exactly T*row_bytes.  NOTE: relies on all copies having identical
    # sizes and nothing else signalling sem[slot].
    pltpu.make_async_copy(row_buf.at[slot], row_buf.at[slot], sem.at[slot]).wait()

    out_ref[...] = (row_buf[slot].astype(jnp.float32) * scale).astype(out_ref.dtype)


@functools.partial(jax.jit, static_argnames=("emb_size", "gather_from_hbm"))
def token_embedding(tokens, emb_table, emb_size, gather_from_hbm=None):
    """tokens: (B, S) int, emb_table: (V, E) float -> (B, S, E) float."""
    B, S = tokens.shape
    V, E = emb_table.shape
    assert E == emb_size
    scale = math.sqrt(float(emb_size))

    itemsize = jnp.dtype(emb_table.dtype).itemsize
    sublane = max(8, 32 // itemsize)      # packed sublane tile: 8 f32 / 16 bf16 / 32 i8
    row_bytes = E * itemsize
    table_bytes = V * E * itemsize

    n = B * S
    T = _choose_tokens_per_step(n, row_bytes, sublane)
    n_pad = _round_up(n, T)
    grid = (n_pad // T,)
    out_block_bytes = T * E * itemsize

    resident_budget, limit_cap = _vmem_budgets()
    if gather_from_hbm is None:
        gather_from_hbm = table_bytes > resident_budget
        # Tiny rows make the per-row HBM DMA path badly transaction-bound
        # (worst on v5e): stretch residency to the hard VMEM ceiling first.
        if gather_from_hbm and row_bytes < 1024 and table_bytes <= limit_cap - (8 << 20):
            gather_from_hbm = False

    # Clamp (PyTorch errors on OOB ids; clamping keeps a bad id from driving an
    # out-of-range row DMA) and pad to whole token tiles.
    tok_flat = jnp.clip(tokens.reshape(-1).astype(jnp.int32), 0, V - 1)
    tok_flat = jnp.pad(tok_flat, (0, n_pad - n))

    out_shape = jax.ShapeDtypeStruct((n_pad, E), emb_table.dtype)
    # TODO(synk): when E < 128, repack the output lane-dense (128//E tokens per
    # 128-lane row) to turn masked vst.msk stores into full-width stores.

    if not gather_from_hbm:
        # Whole table lives in VMEM once (single buffer, one bulk DMA).
        table_spec = pl.BlockSpec(memory_space=pltpu.MemorySpace.VMEM)
        out_spec = pl.BlockSpec((T, E), lambda i: (i, 0))
        if V <= _ONEHOT_MAX_V:
            kernel = functools.partial(_onehot_gather_kernel, scale=scale, vocab_size=V)
            tok_in = tok_flat.reshape(n_pad, 1)
            tok_spec = pl.BlockSpec((T, 1), lambda i: (i, 0))
            vmem_est = table_bytes + 2 * out_block_bytes + T * V * 4
        else:
            kernel = functools.partial(_resident_rowloop_kernel, scale=scale,
                                       tokens_per_step=T, group=sublane)
            tok_in = tok_flat
            # Token ids pipeline through SMEM in T-sized blocks (a few KiB each)
            # instead of one whole-array scalar prefetch.
            tok_spec = pl.BlockSpec((T,), lambda i: (i,),
                                    memory_space=pltpu.MemorySpace.SMEM)
            vmem_est = table_bytes + 2 * out_block_bytes
        vmem_limit = int(min(limit_cap, max(32 << 20, vmem_est + (8 << 20))))
        out_flat = pl.pallas_call(
            kernel,
            out_shape=out_shape,
            grid=grid,
            in_specs=[tok_spec, table_spec],
            out_specs=out_spec,
            compiler_params=pltpu.CompilerParams(
                dimension_semantics=("parallel",),   # distinct output block per step
                vmem_limit_bytes=vmem_limit),
        )(tok_in, emb_table)
    else:
        kernel = functools.partial(_hbm_gather_kernel, scale=scale, tokens_per_step=T)
        vmem_est = 2 * T * E * itemsize + 2 * out_block_bytes
        vmem_limit = int(min(limit_cap, max(32 << 20, vmem_est + (8 << 20))))
        # TODO(synk): for very long sequences, chunk the scalar-prefetched token
        # array (1-D SMEM arrays pad to next_pow2 bytes).
        grid_spec = pltpu.PrefetchScalarGridSpec(
            num_scalar_prefetch=1,                            # token ids -> SMEM (lookahead)
            grid=grid,
            in_specs=[pl.BlockSpec(memory_space=pl.ANY)],     # raw HBM table ref
            out_specs=pl.BlockSpec((T, E), lambda i, tok: (i, 0)),
            scratch_shapes=[
                pltpu.VMEM((2, T, E), emb_table.dtype),       # double-buffered staging
                pltpu.SemaphoreType.DMA((2,)),                # one aggregate sem per slot
            ])
        out_flat = pl.pallas_call(
            kernel,
            out_shape=out_shape,
            grid_spec=grid_spec,
            compiler_params=pltpu.CompilerParams(
                # "arbitrary": the staging lookahead carries a manual dependence
                # between consecutive grid steps, so keep them on one core.
                dimension_semantics=("arbitrary",),
                vmem_limit_bytes=vmem_limit),
        )(tok_flat, emb_table)

    return out_flat[:n].reshape(B, S, E)


if __name__ == "__main__":
    # Small, deterministic synthetic setup (no checkpoint loading).
    vocab_size = 64
    emb_size = 32
    batch, seq = 2, 8

    key = jax.random.PRNGKey(0)
    k_emb, k_tok = jax.random.split(key)

    emb_table = jax.random.normal(k_emb, (vocab_size, emb_size), dtype=jnp.float32)
    tokens = jax.random.randint(k_tok, (batch, seq), 0, vocab_size, dtype=jnp.int32)

    ref = emb_table[tokens] * math.sqrt(emb_size)

    # Path A (resident table, one-hot MXU gather) -- the default for this table.
    out_a = jax.block_until_ready(token_embedding(tokens, emb_table, emb_size))
    assert out_a.shape == (batch, seq, emb_size)
    assert jnp.allclose(out_a, ref, atol=1e-5), "resident-path mismatch vs reference"

    # Path B (per-row HBM DMA gather), forced so both compiled paths are exercised.
    out_b = jax.block_until_ready(
        token_embedding(tokens, emb_table, emb_size, gather_from_hbm=True))
    assert jnp.allclose(out_b, ref, atol=1e-5), "hbm-gather-path mismatch vs reference"

    print("KERNEL_OK")
</pallas_src>

<mosaic_0001>
module attributes {stable_mosaic.version = 11 : i64} {
  func.func @_onehot_gather_kernel(%arg0: i32, %arg1: memref<16x1xi32, #tpu.memory_space<vmem>>, %arg2: memref<64x32xf32, #tpu.memory_space<vmem>>, %arg3: memref<16x32xf32, #tpu.memory_space<vmem>>) attributes {dimension_semantics = [#tpu.dimension_semantics<parallel>], iteration_bounds = array<i64: 1>, scalar_prefetch = 0 : i64, scratch_operands = 0 : i64, tpu.core_type = #tpu.core_type<tc>, window_params = [{transform_indices = @transform_0, window_bounds = array<i64: 16, 1>}, {pipeline_mode = #tpu.pipeline_mode<synchronous>, transform_indices = @transform_1, window_bounds = array<i64: 64, 32>}, {transform_indices = @transform_2, window_bounds = array<i64: 16, 32>}]} {
    %c0 = arith.constant 0 : index
    %c0_0 = arith.constant 0 : index
    %0 = vector.load %arg1[%c0, %c0_0] : memref<16x1xi32, #tpu.memory_space<vmem>>, vector<16x1xi32>
    %1 = tpu.iota {dimensions = array<i32: 1>} : vector<16x64xi32>
    %2 = vector.broadcast %0 : vector<16x1xi32> to vector<16x64xi32>
    %3 = arith.cmpi eq, %2, %1 : vector<16x64xi32>
    %c0_1 = arith.constant 0 : index
    %c0_2 = arith.constant 0 : index
    %4 = vector.load %arg2[%c0_1, %c0_2] : memref<64x32xf32, #tpu.memory_space<vmem>>, vector<64x32xf32>
    %5 = arith.extui %3 : vector<16x64xi1> to vector<16x64xi32>
    %6 = arith.sitofp %5 : vector<16x64xi32> to vector<16x64xf32>
    %cst = arith.constant dense<0.000000e+00> : vector<16x32xf32>
    %7 = tpu.matmul %6, %4, %cst {dimension_numbers = #tpu.dot_dimension_numbers<[1], [0], [0], [1], [0, 0, 1, 1], [], []>, precision = #tpu.contract_precision<fp32>} : vector<16x64xf32>, vector<64x32xf32>, vector<16x32xf32> -> vector<16x32xf32>
    %cst_3 = arith.constant 5.65685415 : f32
    %8 = vector.broadcast %cst_3 : f32 to vector<16x32xf32>
    %9 = arith.mulf %7, %8 : vector<16x32xf32>
    %c0_4 = arith.constant 0 : index
    %c0_5 = arith.constant 0 : index
    %10 = vector.load %arg3[%c0_4, %c0_5] : memref<16x32xf32, #tpu.memory_space<vmem>>, vector<16x32xf32>
    tpu.vector_store %arg3[%c0_4, %c0_5], %9 {strides = array<i32>} : memref<16x32xf32, #tpu.memory_space<vmem>>, vector<16x32xf32>,
    return
  }
  func.func @transform_0(%arg0: i32) -> (i32, i32) {
    %c0_i32 = arith.constant 0 : i32
    %c0_i32_0 = arith.constant 0 : i32
    return %arg0, %c0_i32 : i32, i32
  }
  func.func @transform_1(%arg0: i32) -> (i32, i32) {
    %c0_i32 = arith.constant 0 : i32
    %c0_i32_0 = arith.constant 0 : i32
    %c0_i32_1 = arith.constant 0 : i32
    return %c0_i32, %c0_i32_0 : i32, i32
  }
  func.func @transform_2(%arg0: i32) -> (i32, i32) {
    %c0_i32 = arith.constant 0 : i32
    %c0_i32_0 = arith.constant 0 : i32
    return %arg0, %c0_i32 : i32, i32
  }
}

</mosaic_0001>

<bundles_post_ra>
// kernel: token_embedding.1
= control target key start
LH: loop header
LB: loop body
LE: loop exit
PB: predicated region body
PF: predicated region fallthrough
CT: control target
= control target key end

     0   :  { %v962_v2 = vmov 0   ;;  %s1068_s0 = inlined_call_operand.vmem [shape: s32[16,1], index: 0, kind: input, shape index: {}]   ;;  %s1069_s1 = inlined_call_operand.vmem [shape: f32[64,32], index: 1, kind: input, shape index: {}]   ;;  %s1070_s2 = inlined_call_operand.hbm [shape: f32[16,32], index: 2, kind: output, shape index: {}]  }
   0x1   :  { %v12_v0 = vld [vmem:[%s1068_s0] sm:$0xff]  ;;  %937 = vset.pattern.permute.xlu0 %v962_v2  ;;  %v25_v3 = vld [vmem:[%s1069_s1 + $0x8] sm:$0xff]  ;;  %v26_v5 = vld [vmem:[%s1069_s1 + $0x10] sm:$0xff] }
   0x2   :  { %v24_v1 = vld [vmem:[%s1069_s1] sm:$0xff]  ;;  %v27_v6 = vld [vmem:[%s1069_s1 + $0x18] sm:$0xff]  ;;  %17 = vperm.xlu0 %937, %v12_v0   ;;  %v47_v7 = vand.u32 4294901760, %v25_v3  ;;  %v50_v8 = vand.u32 4294901760, %v26_v5  ;;  %v29_v11 = vld [vmem:[%s1069_s1 + $0x28] sm:$0xff] }
   0x3   :  { %v44_v4 = vand.u32 4294901760, %v24_v1  ;;  %v53_v9 = vand.u32 4294901760, %v27_v6  ;;  %v28_v10 = vld [vmem:[%s1069_s1 + $0x20] sm:$0xff]  ;;  %v13_v12 = vld [vmem:[%s1068_s0 + $0x8] sm:$0xff] }
   0x4   :  { %7 = vsyncpa [#allocation3], 0  ;;  %v56_v15 = vand.u32 4294901760, %v28_v10  ;;  %v59_v16 = vand.u32 4294901760, %v29_v11  ;;  %v30_v17 = vld [vmem:[%s1069_s1 + $0x30] sm:$0xff]  ;;  %v31_v18 = vld [vmem:[%s1069_s1 + $0x38] sm:$0xff]  ;;  %v145_v20 = vsub.f32 %v25_v3, %v47_v7  ;;  %v152_v28 = vsub.f32 %v26_v5, %v50_v8 }
   0x5   :  { %v1006_v13 = vpack.c.bf16 %v47_v7, %v44_v4  ;;  %v1008_v14 = vpack.c.bf16 %v53_v9, %v50_v8  ;;  %v138_v19 = vsub.f32 %v24_v1, %v44_v4  ;;  %v62_v21 = vand.u32 4294901760, %v30_v17  ;;  %s964_s0 = smov [#allocation2]  }
   0x6   :  { %20 = vperm.xlu0 %937, %v13_v12   ;;  %v1021_v22 = vpack.c.bf16 %v59_v16, %v56_v15  ;;  %v65_v23 = vand.u32 4294901760, %v31_v18  ;;  %v146_v25 = vand.u32 4294901760, %v145_v20  ;;  %v159_v29 = vsub.f32 %v27_v6, %v53_v9  ;;  %s633_s1 = sshll.u32 %s964_s0, 4  ;;  %s634_s1 = int_to_ptr.vmem [resolvable:$true] %s633_s1 }
   0x7   :  { %875 = vmatprep.subr.bf16.mxu0 %v1006_v13  ;;  %827 = vmatprep.subr.bf16.mxu1 %v1006_v13  ;;  %v139_v24 = vand.u32 4294901760, %v138_v19  ;;  %v153_v33 = vand.u32 4294901760, %v152_v28  ;;  %v166_v39 = vsub.f32 %v28_v10, %v56_v15  ;;  %v173_v40 = vsub.f32 %v29_v11, %v59_v16  ;;  %s938_s29 = scalar_lea.vmem %s634_s1, 256  ;;  %p943_p1 = scmp.lt.s32.totalorder %s634_s1, %s634_s1 }
   0x8   :  { %877 = vmatpush3.bf16.msra.mxu0 %v1006_v13  ;;  %829 = vmatpush3.bf16.msra.mxu1 %v1006_v13  ;;  %v147_v27 = vsub.f32 %v145_v20, %v146_v25  ;;  %v1027_v30 = vpack.c.bf16 %v65_v23, %v62_v21  ;;  %v160_v34 = vand.u32 4294901760, %v159_v29  ;;  %v180_v47 = vsub.f32 %v30_v17, %v62_v21  ;;  %p939_p0 = scmp.ne.s32.totalorder %s634_s1, %s938_s29  ;;  %p944_p2 = scmp.lt.s32.totalorder %s938_s29, %s938_s29 }
   0x9   :  { %879 = vmatprep.subr.bf16.mxu0 %v1008_v14  ;;  %831 = vmatprep.subr.bf16.mxu1 %v1008_v14  ;;  %v140_v26 = vsub.f32 %v138_v19, %v139_v24  ;;  %v154_v36 = vsub.f32 %v152_v28, %v153_v33  ;;  %v890_v38 = vpack.c.bf16 %v146_v25, %v139_v24  ;;  %v167_v44 = vand.u32 4294901760, %v166_v39 }
   0xa   :  { %v148_v32 = vand.u32 4294901760, %v147_v27  ;;  %v1031_v35 = vpack.c.bf16 %v160_v34, %v153_v33  ;;  %v161_v37 = vsub.f32 %v159_v29, %v160_v34  ;;  %v174_v45 = vand.u32 4294901760, %v173_v40  ;;  %p945_p3 = por %p944_p2, %p943_p1 }
   0xb   :  { %v141_v31 = vand.u32 4294901760, %v140_v26  ;;  %v155_v42 = vand.u32 4294901760, %v154_v36  ;;  %v187_v48 = vsub.f32 %v31_v18, %v65_v23  ;;  %v168_v50 = vsub.f32 %v166_v39, %v167_v44 }
   0xc   :  { %881 = vmatpush3.bf16.msra.mxu0 %v1008_v14  ;;  %833 = vmatpush3.bf16.msra.mxu1 %v1008_v14  ;;  %v162_v43 = vand.u32 4294901760, %v161_v37  ;;  %v898_v49 = vpack.c.bf16 %v174_v45, %v167_v44  ;;  %v175_v51 = vsub.f32 %v173_v40, %v174_v45  ;;  %v181_v52 = vand.u32 4294901760, %v180_v47  ;;  %p946_p4 = pnand %p945_p3, %p939_p0 }
   0xd   :  { %883 = vmatprep.subr.bf16.mxu0 %v1021_v22  ;;  %835 = vmatprep.subr.bf16.mxu1 %v1021_v22  ;;  %v842_v41 = vpack.c.bf16 %v148_v32, %v141_v31  ;;  %v188_v53 = vand.u32 4294901760, %v187_v48  ;;  %v169_v54 = vand.u32 4294901760, %v168_v50  ;;  %v858_v63 = vpack.c.bf16 %v145_v20, %v138_v19 }
   0xe   :  { %v846_v46 = vpack.c.bf16 %v162_v43, %v155_v42  ;;  %v176_v55 = vand.u32 4294901760, %v175_v51  ;;  %v182_v57 = vsub.f32 %v180_v47, %v181_v52  ;;  %v862_v0 = vpack.c.bf16 %v159_v29, %v152_v28 }
   0xf   :  { %v902_v56 = vpack.c.bf16 %v188_v53, %v181_v52  ;;  %v189_v58 = vsub.f32 %v187_v48, %v188_v53  ;;  %v866_v1 = vpack.c.bf16 %v173_v40, %v166_v39  ;;  %v870_v2 = vpack.c.bf16 %v187_v48, %v180_v47 }
  0x10   :  { %885 = vmatpush3.bf16.msra.mxu0 %v1021_v22  ;;  %837 = vmatpush3.bf16.msra.mxu1 %v1021_v22  ;;  %v850_v59 = vpack.c.bf16 %v176_v55, %v169_v54  ;;  %v183_v60 = vand.u32 4294901760, %v182_v57  ;;  %v14_v3 = vlaneseq  ;;  %vm36_vm0 = vcmask 523264  }
  0x11   :  { %887 = vmatprep.subr.bf16.mxu0 %v1027_v30  ;;  %839 = vmatprep.subr.bf16.mxu1 %v1027_v30  ;;  %v190_v61 = vand.u32 4294901760, %v189_v58  ;;  %v963_v6 = vmov 0.0   ;;  %vm625_vm3 = vcmask 261120  }
  0x12   :  { %v15_v4 = vand.u32 127, %v14_v3 }
  0x13   :  { %v854_v62 = vpack.c.bf16 %v190_v61, %v183_v60 }
  0x14   :  { %889 = vmatpush3.bf16.msra.mxu0 %v1027_v30  ;;  %841 = vmatpush3.bf16.msra.mxu1 %v1027_v30 }
  0x15   :  { %891 = vmatprep.subr.bf16.mxu0 %v890_v38  ;;  %843 = vmatprep.subr.bf16.mxu1 %v842_v41 }
  0x81   :  { %v18_v5 = vpop.permute.xlu0 %17 }
  0x82   :  { %vm22_vm1 = vcmp.eq.s32.totalorder %v18_v5, %v15_v4 }
  0x83   :  { %v644_v7 = vsel %vm22_vm1, 1.0, %v963_v6 }
  0x84   :  { %v38_v8 = vsel %vm36_vm0, %v644_v7, 0 }
  0x85   :  { %v117_v9 = vsub.f32 %v38_v8, %v38_v8  ;;  %v21_v10 = vpop.permute.xlu0 %20 }
  0x86   :  { %vm23_vm2 = vcmp.eq.s32.totalorder %v21_v10, %v15_v4 }
  0x87   :  { %v645_v11 = vsel %vm23_vm2, 1.0, %v963_v6  ;;  %v118_v12 = vand.u32 4294901760, %v117_v9 }
  0x88   :  { %v41_v15 = vsel %vm36_vm0, %v645_v11, 0 }
  0x89   :  { %v127_v16 = vsub.f32 %v41_v15, %v41_v15  ;;  %785 = vmatprep.mubr.f32.mxu0 %v118_v12  ;;  %v119_v17 = vsub.f32 %v117_v9, %v118_v12 }
  0x8b   :  { %v120_v18 = vand.u32 4294901760, %v119_v17  ;;  %v128_v19 = vand.u32 4294901760, %v127_v16 }
  0x8d   :  { %728 = vmatprep.mubr.f32.mxu1 %v120_v18  ;;  %786 = vmatmul.mubr.f32.vlgmr.msra.gmra.mrb[0].mxu0 %v128_v19  ;;  %v129_v20 = vsub.f32 %v127_v16, %v128_v19 }
  0x8e   :  { %893 = vmatpush3.bf16.msra.mxu0 %v890_v38  ;;  %804 = vmatprep.mubr.msk.f32.mxu0 %vm36_vm0, %v644_v7 }
  0x8f   :  { %895 = vmatprep.subr.bf16.mxu0 %v1031_v35  ;;  %v130_v21 = vand.u32 4294901760, %v129_v20 }
  0x91   :  { %729 = vmatmul.mubr.f32.vlgmr.msra.gmra.mrb[0].mxu1 %v130_v21 }
  0x92   :  { %845 = vmatpush3.bf16.msra.mxu1 %v842_v41  ;;  %897 = vmatpush3.bf16.msra.mxu0 %v1031_v35 }
  0x93   :  { %747 = vmatprep.mubr.msk.f32.mxu1 %vm36_vm0, %v644_v7  ;;  %847 = vmatprep.subr.bf16.mxu1 %v846_v46 }
  0x94   :  { %899 = vmatprep.subr.bf16.mxu0 %v898_v49 }
  0x96   :  { %849 = vmatpush3.bf16.msra.mxu1 %v846_v46  ;;  %901 = vmatpush3.bf16.msra.mxu0 %v898_v49 }
  0x97   :  { %851 = vmatprep.subr.bf16.mxu1 %v850_v59  ;;  %903 = vmatprep.subr.bf16.mxu0 %v902_v56 }
  0x9a   :  { %853 = vmatpush3.bf16.msra.mxu1 %v850_v59  ;;  %905 = vmatpush3.bf16.msra.mxu0 %v902_v56 }
  0x9b   :  { %855 = vmatprep.subr.bf16.mxu1 %v854_v62  ;;  %907 = vmatprep.subr.bf16.mxu0 %v1006_v13 }
  0x9d   :  { %805 = vmatmul.mubr.msk.f32.vlgmr.msra.gmra.mrb[0].mxu0 %vm36_vm0, %v645_v11 }
  0x9e   :  { %857 = vmatpush3.bf16.msra.mxu1 %v854_v62  ;;  %909 = vmatpush3.bf16.msra.mxu0 %v1006_v13 }
  0x9f   :  { %823 = vmatprep.mubr.msk.f32.mxu0 %vm36_vm0, %v644_v7  ;;  %859 = vmatprep.subr.bf16.mxu1 %v858_v63 }
  0xa0   :  { %911 = vmatprep.subr.bf16.mxu0 %v1008_v14 }
  0xa1   :  { %748 = vmatmul.mubr.msk.f32.vlgmr.msra.gmra.mrb[0].mxu1 %vm36_vm0, %v645_v11 }
  0xa2   :  { %861 = vmatpush3.bf16.msra.mxu1 %v858_v63  ;;  %766 = vmatprep.mubr.f32.mxu1 %v117_v9 }
  0xa3   :  { %913 = vmatpush3.bf16.msra.mxu0 %v1008_v14  ;;  %863 = vmatprep.subr.bf16.mxu1 %v862_v0 }
  0xa4   :  { %915 = vmatprep.subr.bf16.mxu0 %v1021_v22 }
  0xa6   :  { %865 = vmatpush3.bf16.msra.mxu1 %v862_v0 }
  0xa7   :  { %917 = vmatpush3.bf16.msra.mxu0 %v1021_v22  ;;  %867 = vmatprep.subr.bf16.mxu1 %v866_v1 }
  0xa8   :  { %919 = vmatprep.subr.bf16.mxu0 %v1027_v30 }
  0xaa   :  { %869 = vmatpush3.bf16.msra.mxu1 %v866_v1 }
  0xab   :  { %921 = vmatpush3.bf16.msra.mxu0 %v1027_v30  ;;  %871 = vmatprep.subr.bf16.mxu1 %v870_v2 }
  0xae   :  { %824 = vmatmul.mubr.msk.f32.vlgmr.msra.gmra.mrb[0].mxu0 %vm36_vm0, %v645_v11  ;;  %873 = vmatpush3.bf16.msra.mxu1 %v870_v2 }
  0xb1   :  { %767 = vmatmul.mubr.f32.vlgmr.msra.gmra.mrb[0].mxu1 %v127_v16 }
 0x181   :  { %v825_v13 = vpop.f32.mrb[0].mxu0 }
 0x182   :  { %v613_v23 = vpop.f32.mrb[1].mxu0 }
 0x184   :  { %v768_v14 = vpop.f32.mrb[0].mxu1 }
 0x185   :  { %v922_v24 = vadd.f32 %v825_v13, %v768_v14  ;;  %v337_v25 = vpop.f32.mrb[1].mxu1 }
 0x186   :  { %v923_v22 = vadd.f32 %v613_v23, %v337_v25 }
 0x187   :  { %v624_v26 = vmul.f32 5.656854, %v922_v24 }
 0x188   :  { %v623_v27 = vmul.f32 5.656854, %v923_v22 }
 0x189   :  { %627 = vst.msk [vmem:[#allocation2 + $0x8] sm:$0xff] %vm625_vm3, %v624_v26 }
 0x18a   :  { %626 = vst.msk [vmem:[#allocation2] sm:$0xff] %vm625_vm3, %v623_v27 }
 0x18b   :  { %949 = shalt.err (!%p946_p4)
}
 0x18c   :  { %s950_s4 = scalar_lea.hbm %s1070_s2, 256 }
 0x18d   :  { %p951_p5 = scmp.ne.s32.totalorder %s1070_s2, %s950_s4  ;;  %p954_p6 = scmp.lt.u32.totalorder %s950_s4, %s1070_s2 }
 0x18f   :  { %p956_p7 = pnand %p954_p6, %p951_p5 }
 0x191   :  { %959 = shalt.err (!%p956_p7)
}
 0x192   :  { %s965_s9 = smov 128   ;;  %s966_s10 = smov 8  }
 0x193   :  { %639 = dma.vmem_to_hbm [thread:$0]  %s634_s1, 256, %s1070_s2, [#allocation3], %s965_s9, %s965_s9, %s966_s10  }
 0x194   :  { %960 = dma.done.wait [#allocation3], 256  }
 0x195   :  { %961 = vsyncadd [#allocation3], 4294967040 }
 0x196   :  { %643 = vsyncpa [#allocation3], 1 }

</bundles_post_ra>
